<compile_context>
chip_gen: v7x
topology: tpu7x:2x2x1
jax: 0.10.0
libtpu: 0.0.40
codegen_flags: <defaults>
</compile_context>

<pallas_src>
import functools
import math

import jax
import jax.numpy as jnp
import numpy as np
from jax.experimental import pallas as pl
from jax.experimental.pallas import tpu as pltpu

BBOX_XFORM_CLIP = math.log(1000.0 / 16.0)
BOX_WEIGHTS = (10.0, 10.0, 5.0, 5.0)   # ATSS BoxCoder weights (wx, wy, ww, wh)
MAX_L_TILE = 8192                      # anchors per grid step (lane axis), multiple of 128


def permute_and_flatten(x, N, A, C, H, W):
    # GLIP helper (used by the pure-JAX reference only): (N,A*C,H,W) -> (N,H*W*A,C)
    x = x.reshape(N, A, C, H, W)
    x = jnp.transpose(x, (0, 3, 4, 1, 2))
    return x.reshape(N, -1, C)


# --------------------------------------------------------------------------
# Pallas kernel
# --------------------------------------------------------------------------
def _atss_level_kernel(imsize_ref,                       # SMEM (N, 2) int32 [h, w]
                       tok_ref,                          # (1, T, TL)  raw token logits
                       aggT_ref,                         # (C, T)      positive-map MEAN matrix^T
                       ctr_ref,                          # (1, 1, TL)  raw centerness
                       reg_ref,                          # (1, 4, TL)  raw box regression
                       anc_ref,                          # (4, TL)     anchors XYXY (coord-major)
                       scores_ref,                       # (1, C, TL)  sqrt(cls * ctr)
                       mask_ref,                         # (1, 1, TL)  packed cand bits | keep<<C
                       boxes_ref,                        # (1, 4, TL)  decoded, clipped boxes
                       cnt_ref,                          # (1, 1, 8, 128) per-(image,tile) count
                       *, pre_nms_thresh, min_size, num_classes, l_valid, tile_l):
    l = pl.program_id(0)
    n = pl.program_id(1)

    # valid-lane mask for the ragged last tile (only emitted when L % TL != 0)
    valid = None
    if l_valid is not None:
        lane = (jax.lax.broadcasted_iota(jnp.int32, (1, tile_l), 1) + l * tile_l)
        valid = lane < l_valid                                        # (1, TL)

    # ---- grounding logits -> per-class scores (MEAN aggregation) on the MXU ----
    tok = jax.nn.sigmoid(tok_ref[0].astype(jnp.float32))              # (T, TL)
    cls = jnp.dot(aggT_ref[...].astype(jnp.float32), tok,
                  preferred_element_type=jnp.float32)                 # (C, TL)

    cand = cls > pre_nms_thresh                                       # (C, TL)
    if valid is not None:
        cand = jnp.logical_and(cand, valid)

    # ---- centerness-weighted detection scores (sqrt applied, as in Instances) ----
    ctr = jax.nn.sigmoid(ctr_ref[0].astype(jnp.float32))              # (1, TL)
    sc = jnp.sqrt(cls * ctr)                                          # (C, TL)
    if valid is not None:
        sc = jnp.where(valid, sc, 0.0)
    scores_ref[0] = sc

    # ---- ATSS BoxCoder.decode + Boxes.clip, densified to (2, TL) coord pairs ----
    reg = reg_ref[0].astype(jnp.float32)                              # (4, TL) [dx,dy,dw,dh]
    anc = anc_ref[...].astype(jnp.float32)                            # (4, TL) [x1,y1,x2,y2]
    wx, wy, ww, wh = BOX_WEIGHTS                                      # wx==wy, ww==wh

    a_lo, a_hi = anc[0:2, :], anc[2:4, :]
    wh_a = a_hi - a_lo + 1.0                                          # (2,TL) [w, h]
    c_a = 0.5 * (a_hi + a_lo)                                         # (2,TL) [cx, cy]

    d_xy = reg[0:2, :] * (1.0 / wx)                                   # [dx, dy]
    d_wh = jnp.minimum(reg[2:4, :] * (1.0 / ww), BBOX_XFORM_CLIP)     # [dw, dh] (clipped)

    pc = d_xy * wh_a + c_a                                            # [pcx, pcy]
    half = 0.5 * (jnp.exp(d_wh) * wh_a - 1.0)                         # [(pw-1)/2, (ph-1)/2]
    lo = pc - half                                                    # [x1', y1']
    hi = pc + half                                                    # [x2', y2']

    # clip to (image_size[0]-1, image_size[1]-1); image_size = (h, w)
    img_h = imsize_ref[n, 0].astype(jnp.float32)
    img_w = imsize_ref[n, 1].astype(jnp.float32)
    r2 = jax.lax.broadcasted_iota(jnp.int32, (2, 1), 0)
    bound = jnp.where(r2 == 0, img_w - 1.0, img_h - 1.0)              # (2,1) [w-1, h-1]
    lo = jnp.clip(lo, 0.0, bound)
    hi = jnp.clip(hi, 0.0, bound)
    if valid is not None:
        lo = jnp.where(valid, lo, 0.0)
        hi = jnp.where(valid, hi, 0.0)
    boxes_ref[0, 0:2, :] = lo
    boxes_ref[0, 2:4, :] = hi

    # remove_small_boxes (detectron2 BoxMode: w = x2 - x1, no +1)
    wh_box = hi - lo                                                  # (2, TL)
    keep = (wh_box[0:1, :] >= min_size) & (wh_box[1:2, :] >= min_size)
    if valid is not None:
        keep = jnp.logical_and(keep, valid)

    # ---- bit-packed per-anchor mask: bits 0..C-1 = candidate classes, bit C = keep ----
    # (C is small and static; unrolled adds keep the lowering trivially simple)
    packed = jnp.where(keep, 1 << num_classes, 0)                     # (1, TL) int32
    for c in range(num_classes):
        packed = packed + jnp.where(cand[c:c + 1, :], 1 << c, 0)
    mask_ref[0] = packed.astype(jnp.int32)

    # ---- fused per-(image, tile) candidate count (distinct block per step,
    #      so both grid axes stay "parallel") ----
    cnt = jnp.sum(cand.astype(jnp.int32))
    cnt_ref[0, 0] = jnp.zeros((8, 128), jnp.int32) + cnt


# --------------------------------------------------------------------------
# Wrapper: forward_for_single_feature_map hot path
# --------------------------------------------------------------------------
def atss_level_pallas(token_nchw, ctr_nchw, reg_nchw, anchors_xyxy, agg,
                      image_sizes, *, A, pre_nms_thresh, pre_nms_top_n, min_size,
                      max_tile=MAX_L_TILE):
    """Returns (lane-dense / coord-major, lane axis padded to L_out = tiles*TL):
         scores : (N, C, L_out) f32   sqrt(sigmoid(cls_mean) * sigmoid(ctrness))
         mask   : (N, 1, L_out) int32 bit c (<C) = candidate class c, bit C = keep
         counts : (N,)          int32 clamped per-image candidate count
         boxes  : (N, 4, L_out) f32   decoded + clipped boxes, rows [x1,y1,x2,y2]
         L      : int                 valid lane count (padded lanes are zeroed)."""
    assert max_tile % 128 == 0
    N, AT, H, W = token_nchw.shape
    T = AT // A
    C = agg.shape[1]
    L = H * W * A
    # TODO(synk): spill to multiple int32 words for num_classes > 30.
    assert C <= 30, "bit-packed mask supports at most 30 classes"

    # ---- channel-major / coordinate-major flattening (pure reshapes for A==1) ----
    if A == 1:
        tok = token_nchw.reshape(N, T, L)            # (N, T, L)
        ctr = ctr_nchw.reshape(N, 1, L)              # (N, 1, L)
        reg = reg_nchw.reshape(N, 4, L)              # (N, 4, L)
    else:
        def to_channel_major(x, ch):
            x = x.reshape(N, A, ch, H, W)
            x = jnp.transpose(x, (0, 2, 3, 4, 1))    # (N, ch, H, W, A)
            return x.reshape(N, ch, L)
        tok = to_channel_major(token_nchw, T)
        ctr = to_channel_major(ctr_nchw, 1)
        reg = to_channel_major(reg_nchw, 4)
    # anchors are static per level -> this transpose is amortized across calls
    anc = jnp.transpose(anchors_xyxy, (1, 0))        # (4, L)
    aggT = jnp.transpose(agg, (1, 0))                # (C, T)   (tiny)

    # ---- L tiling: no input padding / no jnp.pad HBM round trip ----
    if L <= max_tile:
        TL, num_tiles = L, 1                         # single full-extent (ragged) block
    else:
        TL = max_tile                                # multiple of 128
        num_tiles = (L + TL - 1) // TL               # last tile reads an OOB window
    L_out = num_tiles * TL
    l_valid = L if L_out != L else None

    kernel = functools.partial(
        _atss_level_kernel,
        pre_nms_thresh=float(pre_nms_thresh),
        min_size=float(min_size),
        num_classes=C,
        l_valid=l_valid,
        tile_l=TL,
    )

    out_shape = (
        jax.ShapeDtypeStruct((N, C, L_out), jnp.float32),        # scores
        jax.ShapeDtypeStruct((N, 1, L_out), jnp.int32),          # packed cand/keep mask
        jax.ShapeDtypeStruct((N, 4, L_out), jnp.float32),        # decoded boxes
        jax.ShapeDtypeStruct((N, num_tiles, 8, 128), jnp.int32), # per-tile partial counts
    )

    grid_spec = pltpu.PrefetchScalarGridSpec(
        num_scalar_prefetch=1,
        grid=(num_tiles, N),      # tiles outer, images inner: anchors block index is
                                  # unchanged across consecutive steps (no refetch),
                                  # and every level has >= N steps for megacore.
        in_specs=[
            pl.BlockSpec((1, T, TL), lambda l, n, im: (n, 0, l)),
            pl.BlockSpec((C, T),     lambda l, n, im: (0, 0)),
            pl.BlockSpec((1, 1, TL), lambda l, n, im: (n, 0, l)),
            pl.BlockSpec((1, 4, TL), lambda l, n, im: (n, 0, l)),
            pl.BlockSpec((4, TL),    lambda l, n, im: (0, l)),
        ],
        out_specs=[
            pl.BlockSpec((1, C, TL), lambda l, n, im: (n, 0, l)),
            pl.BlockSpec((1, 1, TL), lambda l, n, im: (n, 0, l)),
            pl.BlockSpec((1, 4, TL), lambda l, n, im: (n, 0, l)),
            pl.BlockSpec((1, 1, 8, 128), lambda l, n, im: (n, l, 0, 0)),
        ],
    )

    # Double-buffered per-step VMEM estimate (+slack); raised above v5e's 16 MiB
    # scoped default, capped well under v7x's 64 MiB physical.
    step_bytes = (T * TL * tok.dtype.itemsize + TL * ctr.dtype.itemsize
                  + 4 * TL * reg.dtype.itemsize + 4 * TL * anc.dtype.itemsize
                  + C * T * 4                                        # inputs
                  + C * TL * 4 + TL * 4 + 4 * TL * 4 + 8 * 128 * 4)  # outputs
    vmem_limit = int(min(max(2 * step_bytes + (4 << 20), 32 << 20), 48 << 20))

    scores, mask, boxes, cnt = pl.pallas_call(
        kernel,
        out_shape=out_shape,
        grid_spec=grid_spec,
        compiler_params=pltpu.CompilerParams(
            dimension_semantics=("parallel", "parallel"),
            vmem_limit_bytes=vmem_limit),
    )(image_sizes, tok, aggT, ctr, reg, anc)

    # Clamped per-image candidate count from the tiny fused per-tile partials
    # (no re-read of the big mask array, no extra big-reduce dispatch).
    counts = jnp.minimum(cnt[:, :, 0, 0].sum(axis=1), pre_nms_top_n).astype(jnp.int32)

    # Outputs intentionally stay L_out-padded (padded lanes: scores=boxes=0,
    # mask=0) — no post-kernel slices / per-level concat HBM round trips.
    return scores, mask, counts, boxes, L


# --------------------------------------------------------------------------
# Pure-JAX reference (mirrors the PyTorch math; anchor-major layouts)
# --------------------------------------------------------------------------
def reference_level(token_nchw, ctr_nchw, reg_nchw, anchors, agg, image_sizes,
                    *, A, pre_nms_thresh, pre_nms_top_n, min_size):
    N, AT, H, W = token_nchw.shape
    T = AT // A
    tok = jax.nn.sigmoid(permute_and_flatten(token_nchw, N, A, T, H, W))
    scores = tok @ agg                                               # (N, L, C)
    cand = scores > pre_nms_thresh
    counts = jnp.minimum(cand.reshape(N, -1).sum(-1), pre_nms_top_n).astype(jnp.int32)
    ctr = jax.nn.sigmoid(permute_and_flatten(ctr_nchw, N, A, 1, H, W).reshape(N, -1))
    sqrt_scores = jnp.sqrt(scores * ctr[:, :, None])

    reg = permute_and_flatten(reg_nchw, N, A, 4, H, W)               # (N, L, 4)
    wa = anchors[:, 2] - anchors[:, 0] + 1.0
    ha = anchors[:, 3] - anchors[:, 1] + 1.0
    cxa = (anchors[:, 2] + anchors[:, 0]) * 0.5
    cya = (anchors[:, 3] + anchors[:, 1]) * 0.5
    wx, wy, ww, wh = BOX_WEIGHTS
    dx, dy = reg[..., 0] / wx, reg[..., 1] / wy
    dw = jnp.minimum(reg[..., 2] / ww, BBOX_XFORM_CLIP)
    dh = jnp.minimum(reg[..., 3] / wh, BBOX_XFORM_CLIP)
    pcx, pcy = dx * wa + cxa, dy * ha + cya
    pw, ph = jnp.exp(dw) * wa, jnp.exp(dh) * ha
    x1, y1 = pcx - 0.5 * (pw - 1.0), pcy - 0.5 * (ph - 1.0)
    x2, y2 = pcx + 0.5 * (pw - 1.0), pcy + 0.5 * (ph - 1.0)
    img_h = image_sizes[:, 0:1].astype(jnp.float32)
    img_w = image_sizes[:, 1:2].astype(jnp.float32)
    x1 = jnp.clip(x1, 0.0, img_w - 1.0); y1 = jnp.clip(y1, 0.0, img_h - 1.0)
    x2 = jnp.clip(x2, 0.0, img_w - 1.0); y2 = jnp.clip(y2, 0.0, img_h - 1.0)
    boxes = jnp.stack([x1, y1, x2, y2], axis=-1)                     # (N, L, 4)
    keep = ((x2 - x1) >= min_size) & ((y2 - y1) >= min_size)
    return sqrt_scores, cand, counts, boxes, keep


def make_anchors(H, W, stride):
    size = 4.0 * stride
    ys = (jnp.arange(H, dtype=jnp.float32) + 0.5) * stride
    xs = (jnp.arange(W, dtype=jnp.float32) + 0.5) * stride
    cy, cx = jnp.meshgrid(ys, xs, indexing="ij")
    half = size / 2.0
    boxes = jnp.stack([cx - half, cy - half, cx + half, cy + half], axis=-1)
    return boxes.reshape(-1, 4)                                      # (H*W*A, 4), A=1


# --------------------------------------------------------------------------
if __name__ == "__main__":
    key = jax.random.PRNGKey(0)

    # ATSSPostProcessor config (deterministic, synthetic)
    N, A, T, C = 2, 1, 16, 8
    pre_nms_thresh = 0.05
    pre_nms_top_n = 1000
    min_size = 0.0

    # positive_map: label -> token indices (MEAN score aggregation)
    positive_map = {0: [0, 1], 1: [2], 2: [3, 4, 5], 3: [6],
                    4: [7, 8], 5: [9, 10], 6: [11, 12, 13], 7: [14, 15]}
    agg_np = np.zeros((T, C), dtype=np.float32)
    for j, toks in positive_map.items():
        for t in toks:
            agg_np[t, j] = 1.0 / len(toks)
    agg = jnp.asarray(agg_np)

    image_sizes = jnp.array([[120, 128], [110, 96]], dtype=jnp.int32)    # (h, w) per image

    # Levels with L = 256, 64, 120, 270; the last one is re-run with a small
    # tile to exercise the multi-tile + ragged (OOB last block) path.
    level_shapes = [(16, 16, 8), (8, 8, 16), (12, 10, 32), (18, 15, 4)]
    cfg = dict(A=A, pre_nms_thresh=pre_nms_thresh,
               pre_nms_top_n=pre_nms_top_n, min_size=min_size)

    def check(out, ref, L, C):
        scores, mask, counts, boxes, _ = out
        ref_scores = np.transpose(np.asarray(ref[0]), (0, 2, 1))          # (N, C, L)
        ref_cand = np.transpose(np.asarray(ref[1]).astype(np.int32), (0, 2, 1))
        ref_counts = np.asarray(ref[2])
        ref_boxes = np.transpose(np.asarray(ref[3]), (0, 2, 1))           # (N, 4, L)
        ref_keep = np.asarray(ref[4]).astype(np.int32)

        m = np.asarray(mask)[:, 0, :L]                                    # (N, L)
        cand = (m[:, None, :] >> np.arange(C)[None, :, None]) & 1         # (N, C, L)
        keep = (m >> C) & 1                                               # (N, L)

        np.testing.assert_allclose(np.asarray(scores)[:, :, :L], ref_scores,
                                   rtol=1e-2, atol=5e-3)                  # scores (MXU path)
        np.testing.assert_allclose(np.asarray(boxes)[:, :, :L], ref_boxes,
                                   rtol=1e-4, atol=1e-2)                  # boxes
        assert int(np.sum(keep != ref_keep)) <= 8, "keep mask diverged"
        assert int(np.sum(cand != ref_cand)) <= 16, \
            "candidate mask diverged more than matmul rounding allows"
        assert np.all(np.abs(np.asarray(counts) - ref_counts) <= 16), \
            "candidate counts diverged more than matmul rounding allows"
        # padded lanes must be fully masked (downstream gates on mask/counts)
        assert np.all(np.asarray(mask)[:, :, L:] == 0)
        assert np.all(np.asarray(scores)[:, :, L:] == 0.0)
        assert np.all(np.asarray(boxes)[:, :, L:] == 0.0)

    level_outputs = []
    for li, (H, W, stride) in enumerate(level_shapes):
        key, k1, k2, k3 = jax.random.split(key, 4)
        token_nchw = jax.random.normal(k1, (N, A * T, H, W), jnp.float32)
        ctr_nchw = jax.random.normal(k2, (N, A * 1, H, W), jnp.float32)
        reg_nchw = jax.random.normal(k3, (N, A * 4, H, W), jnp.float32)
        anchors = make_anchors(H, W, stride)

        ref = reference_level(token_nchw, ctr_nchw, reg_nchw, anchors, agg,
                              image_sizes, **cfg)

        out = atss_level_pallas(token_nchw, ctr_nchw, reg_nchw, anchors, agg,
                                image_sizes, **cfg)
        jax.block_until_ready(out[:4])
        check(out, ref, H * W * A, C)
        level_outputs.append(out)

        if li == len(level_shapes) - 1:
            # Force the multi-tile + ragged path: L=270, TL=128 -> 3 tiles,
            # last tile reads a clipped OOB window and masks 114 padded lanes.
            out2 = atss_level_pallas(token_nchw, ctr_nchw, reg_nchw, anchors, agg,
                                     image_sizes, max_tile=128, **cfg)
            jax.block_until_ready(out2[:4])
            check(out2, ref, H * W * A, C)

    # TODO(synk): per-image variable-length top-k over (scores, mask, counts),
    # batched_nms / batched_soft_nms, the fpn_post_nms_top_n kthvalue truncation
    # and Instances indexing / Instances.cat are dynamic-shape host-side ops
    # (not implemented in Pallas); they consume the padded per-level outputs.

    print("KERNEL_OK")
</pallas_src>

<mosaic_0001>
module attributes {stable_mosaic.version = 11 : i64} {
  func.func @_atss_level_kernel(%arg0: i32, %arg1: i32, %arg2: memref<2x2xi32, #tpu.memory_space<smem>>, %arg3: memref<1x16x256xf32, #tpu.memory_space<vmem>>, %arg4: memref<8x16xf32, #tpu.memory_space<vmem>>, %arg5: memref<1x1x256xf32, #tpu.memory_space<vmem>>, %arg6: memref<1x4x256xf32, #tpu.memory_space<vmem>>, %arg7: memref<4x256xf32, #tpu.memory_space<vmem>>, %arg8: memref<1x8x256xf32, #tpu.memory_space<vmem>>, %arg9: memref<1x1x256xi32, #tpu.memory_space<vmem>>, %arg10: memref<1x4x256xf32, #tpu.memory_space<vmem>>, %arg11: memref<1x1x8x128xi32, #tpu.memory_space<vmem>>) attributes {dimension_semantics = [#tpu.dimension_semantics<parallel>, #tpu.dimension_semantics<parallel>], iteration_bounds = array<i64: 1, 2>, scalar_prefetch = 1 : i64, scratch_operands = 0 : i64, tpu.core_type = #tpu.core_type<tc>, window_params = [{transform_indices = @transform_0, window_bounds = array<i64: 1, 16, 256>}, {pipeline_mode = #tpu.pipeline_mode<synchronous>, transform_indices = @transform_1, window_bounds = array<i64: 8, 16>}, {transform_indices = @transform_2, window_bounds = array<i64: 1, 1, 256>}, {transform_indices = @transform_3, window_bounds = array<i64: 1, 4, 256>}, {transform_indices = @transform_4, window_bounds = array<i64: 4, 256>}, {transform_indices = @transform_5, window_bounds = array<i64: 1, 8, 256>}, {transform_indices = @transform_6, window_bounds = array<i64: 1, 1, 256>}, {transform_indices = @transform_7, window_bounds = array<i64: 1, 4, 256>}, {transform_indices = @transform_8, window_bounds = array<i64: 1, 1, 8, 128>}]} {
    %c0 = arith.constant 0 : index
    %c0_0 = arith.constant 0 : index
    %c0_1 = arith.constant 0 : index
    %0 = vector.load %arg3[%c0, %c0_0, %c0_1] : memref<1x16x256xf32, #tpu.memory_space<vmem>>, vector<1x16x256xf32>
    %1 = vector.shape_cast %0 : vector<1x16x256xf32> to vector<16x256xf32>
    %2 = arith.negf %1 : vector<16x256xf32>
    %3 = math.exp %2 : vector<16x256xf32>
    %cst = arith.constant 1.000000e+00 : f32
    %4 = vector.broadcast %cst : f32 to vector<16x256xf32>
    %5 = arith.addf %4, %3 : vector<16x256xf32>
    %6 = arith.divf %4, %5 : vector<16x256xf32>
    %c0_2 = arith.constant 0 : index
    %c0_3 = arith.constant 0 : index
    %7 = vector.load %arg4[%c0_2, %c0_3] : memref<8x16xf32, #tpu.memory_space<vmem>>, vector<8x16xf32>
    %cst_4 = arith.constant dense<0.000000e+00> : vector<8x256xf32>
    %8 = tpu.matmul %7, %6, %cst_4 {dimension_numbers = #tpu.dot_dimension_numbers<[1], [0], [0], [1], [0, 0, 1, 1], [], []>} : vector<8x16xf32>, vector<16x256xf32>, vector<8x256xf32> -> vector<8x256xf32>
    %cst_5 = arith.constant 5.000000e-02 : f32
    %9 = vector.broadcast %cst_5 : f32 to vector<8x256xf32>
    %10 = arith.cmpf ogt, %8, %9 : vector<8x256xf32>
    %c0_6 = arith.constant 0 : index
    %c0_7 = arith.constant 0 : index
    %c0_8 = arith.constant 0 : index
    %11 = vector.load %arg5[%c0_6, %c0_7, %c0_8] : memref<1x1x256xf32, #tpu.memory_space<vmem>>, vector<1x1x256xf32>
    %12 = vector.shape_cast %11 : vector<1x1x256xf32> to vector<1x256xf32>
    %13 = arith.negf %12 : vector<1x256xf32>
    %14 = math.exp %13 : vector<1x256xf32>
    %cst_9 = arith.constant 1.000000e+00 : f32
    %15 = vector.broadcast %cst_9 : f32 to vector<1x256xf32>
    %16 = arith.addf %15, %14 : vector<1x256xf32>
    %17 = arith.divf %15, %16 : vector<1x256xf32>
    %18 = vector.broadcast %17 : vector<1x256xf32> to vector<8x256xf32>
    %19 = arith.mulf %8, %18 : vector<8x256xf32>
    %20 = math.sqrt %19 : vector<8x256xf32>
    %c0_10 = arith.constant 0 : index
    %c0_11 = arith.constant 0 : index
    %c0_12 = arith.constant 0 : index
    %21 = vector.load %arg8[%c0_10, %c0_11, %c0_12] : memref<1x8x256xf32, #tpu.memory_space<vmem>>, vector<1x8x256xf32>
    %22 = vector.shape_cast %21 : vector<1x8x256xf32> to vector<8x256xf32>
    %23 = vector.shape_cast %20 : vector<8x256xf32> to vector<1x8x256xf32>
    tpu.vector_store %arg8[%c0_10, %c0_11, %c0_12], %23 {strides = array<i32>} : memref<1x8x256xf32, #tpu.memory_space<vmem>>, vector<1x8x256xf32>,
    %c0_13 = arith.constant 0 : index
    %c0_14 = arith.constant 0 : index
    %c0_15 = arith.constant 0 : index
    %24 = vector.load %arg6[%c0_13, %c0_14, %c0_15] : memref<1x4x256xf32, #tpu.memory_space<vmem>>, vector<1x4x256xf32>
    %25 = vector.shape_cast %24 : vector<1x4x256xf32> to vector<4x256xf32>
    %c0_16 = arith.constant 0 : index
    %c0_17 = arith.constant 0 : index
    %26 = vector.load %arg7[%c0_16, %c0_17] : memref<4x256xf32, #tpu.memory_space<vmem>>, vector<4x256xf32>
    %27 = vector.extract_strided_slice %26 {offsets = [0, 0], sizes = [2, 256], strides = [1, 1]} : vector<4x256xf32> to vector<2x256xf32>
    %28 = vector.extract_strided_slice %26 {offsets = [2, 0], sizes = [2, 256], strides = [1, 1]} : vector<4x256xf32> to vector<2x256xf32>
    %29 = arith.subf %28, %27 : vector<2x256xf32>
    %cst_18 = arith.constant 1.000000e+00 : f32
    %30 = vector.broadcast %cst_18 : f32 to vector<2x256xf32>
    %31 = arith.addf %29, %30 : vector<2x256xf32>
    %32 = arith.addf %28, %27 : vector<2x256xf32>
    %cst_19 = arith.constant 5.000000e-01 : f32
    %33 = vector.broadcast %cst_19 : f32 to vector<2x256xf32>
    %34 = arith.mulf %33, %32 : vector<2x256xf32>
    %35 = vector.extract_strided_slice %25 {offsets = [0, 0], sizes = [2, 256], strides = [1, 1]} : vector<4x256xf32> to vector<2x256xf32>
    %cst_20 = arith.constant 1.000000e-01 : f32
    %36 = vector.broadcast %cst_20 : f32 to vector<2x256xf32>
    %37 = arith.mulf %35, %36 : vector<2x256xf32>
    %38 = vector.extract_strided_slice %25 {offsets = [2, 0], sizes = [2, 256], strides = [1, 1]} : vector<4x256xf32> to vector<2x256xf32>
    %cst_21 = arith.constant 2.000000e-01 : f32
    %39 = vector.broadcast %cst_21 : f32 to vector<2x256xf32>
    %40 = arith.mulf %38, %39 : vector<2x256xf32>
    %cst_22 = arith.constant 4.13516665 : f32
    %41 = vector.broadcast %cst_22 : f32 to vector<2x256xf32>
    %42 = arith.minimumf %40, %41 : vector<2x256xf32>
    %43 = arith.mulf %37, %31 : vector<2x256xf32>
    %44 = arith.addf %43, %34 : vector<2x256xf32>
    %45 = math.exp %42 : vector<2x256xf32>
    %46 = arith.mulf %45, %31 : vector<2x256xf32>
    %cst_23 = arith.constant 1.000000e+00 : f32
    %47 = vector.broadcast %cst_23 : f32 to vector<2x256xf32>
    %48 = arith.subf %46, %47 : vector<2x256xf32>
    %cst_24 = arith.constant 5.000000e-01 : f32
    %49 = vector.broadcast %cst_24 : f32 to vector<2x256xf32>
    %50 = arith.mulf %49, %48 : vector<2x256xf32>
    %51 = arith.subf %44, %50 : vector<2x256xf32>
    %52 = arith.addf %44, %50 : vector<2x256xf32>
    %53 = arith.index_cast %arg1 : i32 to index
    %c0_25 = arith.constant 0 : index
    %54 = memref.load %arg2[%53, %c0_25] : memref<2x2xi32, #tpu.memory_space<smem>>
    %55 = arith.sitofp %54 : i32 to f32
    %56 = arith.index_cast %arg1 : i32 to index
    %c1 = arith.constant 1 : index
    %57 = memref.load %arg2[%56, %c1] : memref<2x2xi32, #tpu.memory_space<smem>>
    %58 = arith.sitofp %57 : i32 to f32
    %59 = tpu.iota {dimensions = array<i32: 0>} : vector<2x1xi32>
    %c0_i32 = arith.constant 0 : i32
    %60 = vector.broadcast %c0_i32 : i32 to vector<2x1xi32>
    %61 = arith.cmpi eq, %59, %60 : vector<2x1xi32>
    %cst_26 = arith.constant 1.000000e+00 : f32
    %62 = arith.subf %58, %cst_26 : f32
    %cst_27 = arith.constant 1.000000e+00 : f32
    %63 = arith.subf %55, %cst_27 : f32
    %64 = vector.broadcast %62 : f32 to vector<2x1xf32>
    %65 = vector.broadcast %63 : f32 to vector<2x1xf32>
    %66 = arith.select %61, %64, %65 : vector<2x1xi1>, vector<2x1xf32>
    %cst_28 = arith.constant 0.000000e+00 : f32
    %67 = vector.broadcast %cst_28 : f32 to vector<2x256xf32>
    %68 = arith.maximumf %67, %51 : vector<2x256xf32>
    %69 = vector.broadcast %66 : vector<2x1xf32> to vector<2x256xf32>
    %70 = arith.minimumf %69, %68 : vector<2x256xf32>
    %cst_29 = arith.constant 0.000000e+00 : f32
    %71 = vector.broadcast %cst_29 : f32 to vector<2x256xf32>
    %72 = arith.maximumf %71, %52 : vector<2x256xf32>
    %73 = vector.broadcast %66 : vector<2x1xf32> to vector<2x256xf32>
    %74 = arith.minimumf %73, %72 : vector<2x256xf32>
    %c0_30 = arith.constant 0 : index
    %c0_31 = arith.constant 0 : index
    %c0_32 = arith.constant 0 : index
    %75 = vector.load %arg10[%c0_30, %c0_31, %c0_32] : memref<1x4x256xf32, #tpu.memory_space<vmem>>, vector<1x2x256xf32>
    %76 = vector.shape_cast %75 : vector<1x2x256xf32> to vector<2x256xf32>
    %77 = vector.shape_cast %70 : vector<2x256xf32> to vector<1x2x256xf32>
    tpu.vector_store %arg10[%c0_30, %c0_31, %c0_32], %77 {strides = array<i32>} : memref<1x4x256xf32, #tpu.memory_space<vmem>>, vector<1x2x256xf32>,
    %c0_33 = arith.constant 0 : index
    %c2 = arith.constant 2 : index
    %c0_34 = arith.constant 0 : index
    %78 = vector.load %arg10[%c0_33, %c2, %c0_34] : memref<1x4x256xf32, #tpu.memory_space<vmem>>, vector<1x2x256xf32>
    %79 = vector.shape_cast %78 : vector<1x2x256xf32> to vector<2x256xf32>
    %80 = vector.shape_cast %74 : vector<2x256xf32> to vector<1x2x256xf32>
    tpu.vector_store %arg10[%c0_33, %c2, %c0_34], %80 {strides = array<i32>} : memref<1x4x256xf32, #tpu.memory_space<vmem>>, vector<1x2x256xf32>,
    %81 = arith.subf %74, %70 : vector<2x256xf32>
    %82 = vector.extract_strided_slice %81 {offsets = [0, 0], sizes = [1, 256], strides = [1, 1]} : vector<2x256xf32> to vector<1x256xf32>
    %cst_35 = arith.constant 0.000000e+00 : f32
    %83 = vector.broadcast %cst_35 : f32 to vector<1x256xf32>
    %84 = arith.cmpf oge, %82, %83 : vector<1x256xf32>
    %85 = vector.extract_strided_slice %81 {offsets = [1, 0], sizes = [1, 256], strides = [1, 1]} : vector<2x256xf32> to vector<1x256xf32>
    %cst_36 = arith.constant 0.000000e+00 : f32
    %86 = vector.broadcast %cst_36 : f32 to vector<1x256xf32>
    %87 = arith.cmpf oge, %85, %86 : vector<1x256xf32>
    %88 = arith.andi %84, %87 : vector<1x256xi1>
    %c256_i32 = arith.constant 256 : i32
    %c0_i32_37 = arith.constant 0 : i32
    %89 = vector.broadcast %c256_i32 : i32 to vector<1x256xi32>
    %90 = vector.broadcast %c0_i32_37 : i32 to vector<1x256xi32>
    %91 = arith.select %88, %89, %90 : vector<1x256xi1>, vector<1x256xi32>
    %92 = vector.extract_strided_slice %10 {offsets = [0, 0], sizes = [1, 256], strides = [1, 1]} : vector<8x256xi1> to vector<1x256xi1>
    %c1_i32 = arith.constant 1 : i32
    %c0_i32_38 = arith.constant 0 : i32
    %93 = vector.broadcast %c1_i32 : i32 to vector<1x256xi32>
    %94 = vector.broadcast %c0_i32_38 : i32 to vector<1x256xi32>
    %95 = arith.select %92, %93, %94 : vector<1x256xi1>, vector<1x256xi32>
    %96 = arith.addi %91, %95 : vector<1x256xi32>
    %97 = vector.extract_strided_slice %10 {offsets = [1, 0], sizes = [1, 256], strides = [1, 1]} : vector<8x256xi1> to vector<1x256xi1>
    %c2_i32 = arith.constant 2 : i32
    %c0_i32_39 = arith.constant 0 : i32
    %98 = vector.broadcast %c2_i32 : i32 to vector<1x256xi32>
    %99 = vector.broadcast %c0_i32_39 : i32 to vector<1x256xi32>
    %100 = arith.select %97, %98, %99 : vector<1x256xi1>, vector<1x256xi32>
    %101 = arith.addi %96, %100 : vector<1x256xi32>
    %102 = vector.extract_strided_slice %10 {offsets = [2, 0], sizes = [1, 256], strides = [1, 1]} : vector<8x256xi1> to vector<1x256xi1>
    %c4_i32 = arith.constant 4 : i32
    %c0_i32_40 = arith.constant 0 : i32
    %103 = vector.broadcast %c4_i32 : i32 to vector<1x256xi32>
    %104 = vector.broadcast %c0_i32_40 : i32 to vector<1x256xi32>
    %105 = arith.select %102, %103, %104 : vector<1x256xi1>, vector<1x256xi32>
    %106 = arith.addi %101, %105 : vector<1x256xi32>
    %107 = vector.extract_strided_slice %10 {offsets = [3, 0], sizes = [1, 256], strides = [1, 1]} : vector<8x256xi1> to vector<1x256xi1>
    %c8_i32 = arith.constant 8 : i32
    %c0_i32_41 = arith.constant 0 : i32
    %108 = vector.broadcast %c8_i32 : i32 to vector<1x256xi32>
    %109 = vector.broadcast %c0_i32_41 : i32 to vector<1x256xi32>
    %110 = arith.select %107, %108, %109 : vector<1x256xi1>, vector<1x256xi32>
    %111 = arith.addi %106, %110 : vector<1x256xi32>
    %112 = vector.extract_strided_slice %10 {offsets = [4, 0], sizes = [1, 256], strides = [1, 1]} : vector<8x256xi1> to vector<1x256xi1>
    %c16_i32 = arith.constant 16 : i32
    %c0_i32_42 = arith.constant 0 : i32
    %113 = vector.broadcast %c16_i32 : i32 to vector<1x256xi32>
    %114 = vector.broadcast %c0_i32_42 : i32 to vector<1x256xi32>
    %115 = arith.select %112, %113, %114 : vector<1x256xi1>, vector<1x256xi32>
    %116 = arith.addi %111, %115 : vector<1x256xi32>
    %117 = vector.extract_strided_slice %10 {offsets = [5, 0], sizes = [1, 256], strides = [1, 1]} : vector<8x256xi1> to vector<1x256xi1>
    %c32_i32 = arith.constant 32 : i32
    %c0_i32_43 = arith.constant 0 : i32
    %118 = vector.broadcast %c32_i32 : i32 to vector<1x256xi32>
    %119 = vector.broadcast %c0_i32_43 : i32 to vector<1x256xi32>
    %120 = arith.select %117, %118, %119 : vector<1x256xi1>, vector<1x256xi32>
    %121 = arith.addi %116, %120 : vector<1x256xi32>
    %122 = vector.extract_strided_slice %10 {offsets = [6, 0], sizes = [1, 256], strides = [1, 1]} : vector<8x256xi1> to vector<1x256xi1>
    %c64_i32 = arith.constant 64 : i32
    %c0_i32_44 = arith.constant 0 : i32
    %123 = vector.broadcast %c64_i32 : i32 to vector<1x256xi32>
    %124 = vector.broadcast %c0_i32_44 : i32 to vector<1x256xi32>
    %125 = arith.select %122, %123, %124 : vector<1x256xi1>, vector<1x256xi32>
    %126 = arith.addi %121, %125 : vector<1x256xi32>
    %127 = vector.extract_strided_slice %10 {offsets = [7, 0], sizes = [1, 256], strides = [1, 1]} : vector<8x256xi1> to vector<1x256xi1>
    %c128_i32 = arith.constant 128 : i32
    %c0_i32_45 = arith.constant 0 : i32
    %128 = vector.broadcast %c128_i32 : i32 to vector<1x256xi32>
    %129 = vector.broadcast %c0_i32_45 : i32 to vector<1x256xi32>
    %130 = arith.select %127, %128, %129 : vector<1x256xi1>, vector<1x256xi32>
    %131 = arith.addi %126, %130 : vector<1x256xi32>
    %c0_46 = arith.constant 0 : index
    %c0_47 = arith.constant 0 : index
    %c0_48 = arith.constant 0 : index
    %132 = vector.load %arg9[%c0_46, %c0_47, %c0_48] : memref<1x1x256xi32, #tpu.memory_space<vmem>>, vector<1x1x256xi32>
    %133 = vector.shape_cast %132 : vector<1x1x256xi32> to vector<1x256xi32>
    %134 = vector.shape_cast %131 : vector<1x256xi32> to vector<1x1x256xi32>
    tpu.vector_store %arg9[%c0_46, %c0_47, %c0_48], %134 {strides = array<i32>} : memref<1x1x256xi32, #tpu.memory_space<vmem>>, vector<1x1x256xi32>,
    %135 = arith.extui %10 : vector<8x256xi1> to vector<8x256xi32>
    %136 = vector.shape_cast %135 : vector<8x256xi32> to vector<1x8x256xi32>
    %cst_49 = arith.constant dense<0> : vector<1xi32>
    %137 = vector.multi_reduction <add>, %136, %cst_49 [1, 2] : vector<1x8x256xi32> to vector<1xi32>
    %138 = vector.shape_cast %137 : vector<1xi32> to vector<1x1x1xi32>
    %139 = vector.extract %138[0, 0, 0] : i32 from vector<1x1x1xi32>
    %c0_i32_50 = arith.constant 0 : i32
    %140 = vector.broadcast %c0_i32_50 : i32 to vector<8x128xi32>
    %141 = vector.broadcast %139 : i32 to vector<8x128xi32>
    %142 = arith.addi %140, %141 : vector<8x128xi32>
    %c0_51 = arith.constant 0 : index
    %c0_52 = arith.constant 0 : index
    %c0_53 = arith.constant 0 : index
    %c0_54 = arith.constant 0 : index
    %143 = vector.load %arg11[%c0_51, %c0_52, %c0_53, %c0_54] : memref<1x1x8x128xi32, #tpu.memory_space<vmem>>, vector<1x1x8x128xi32>
    %144 = vector.shape_cast %143 : vector<1x1x8x128xi32> to vector<8x128xi32>
    %145 = vector.shape_cast %142 : vector<8x128xi32> to vector<1x1x8x128xi32>
    tpu.vector_store %arg11[%c0_51, %c0_52, %c0_53, %c0_54], %145 {strides = array<i32>} : memref<1x1x8x128xi32, #tpu.memory_space<vmem>>, vector<1x1x8x128xi32>,
    return
  }
  func.func @transform_0(%arg0: i32, %arg1: i32, %arg2: memref<2x2xi32, #tpu.memory_space<smem>>) -> (i32, i32, i32) {
    %c0_i32 = arith.constant 0 : i32
    %c0_i32_0 = arith.constant 0 : i32
    return %arg1, %c0_i32, %arg0 : i32, i32, i32
  }
  func.func @transform_1(%arg0: i32, %arg1: i32, %arg2: memref<2x2xi32, #tpu.memory_space<smem>>) -> (i32, i32) {
    %c0_i32 = arith.constant 0 : i32
    %c0_i32_0 = arith.constant 0 : i32
    %c0_i32_1 = arith.constant 0 : i32
    return %c0_i32, %c0_i32_0 : i32, i32
  }
  func.func @transform_2(%arg0: i32, %arg1: i32, %arg2: memref<2x2xi32, #tpu.memory_space<smem>>) -> (i32, i32, i32) {
    %c0_i32 = arith.constant 0 : i32
    %c0_i32_0 = arith.constant 0 : i32
    return %arg1, %c0_i32, %arg0 : i32, i32, i32
  }
  func.func @transform_3(%arg0: i32, %arg1: i32, %arg2: memref<2x2xi32, #tpu.memory_space<smem>>) -> (i32, i32, i32) {
    %c0_i32 = arith.constant 0 : i32
    %c0_i32_0 = arith.constant 0 : i32
    return %arg1, %c0_i32, %arg0 : i32, i32, i32
  }
  func.func @transform_4(%arg0: i32, %arg1: i32, %arg2: memref<2x2xi32, #tpu.memory_space<smem>>) -> (i32, i32) {
    %c0_i32 = arith.constant 0 : i32
    %c0_i32_0 = arith.constant 0 : i32
    return %c0_i32, %arg0 : i32, i32
  }
  func.func @transform_5(%arg0: i32, %arg1: i32, %arg2: memref<2x2xi32, #tpu.memory_space<smem>>) -> (i32, i32, i32) {
    %c0_i32 = arith.constant 0 : i32
    %c0_i32_0 = arith.constant 0 : i32
    return %arg1, %c0_i32, %arg0 : i32, i32, i32
  }
  func.func @transform_6(%arg0: i32, %arg1: i32, %arg2: memref<2x2xi32, #tpu.memory_space<smem>>) -> (i32, i32, i32) {
    %c0_i32 = arith.constant 0 : i32
    %c0_i32_0 = arith.constant 0 : i32
    return %arg1, %c0_i32, %arg0 : i32, i32, i32
  }
  func.func @transform_7(%arg0: i32, %arg1: i32, %arg2: memref<2x2xi32, #tpu.memory_space<smem>>) -> (i32, i32, i32) {
    %c0_i32 = arith.constant 0 : i32
    %c0_i32_0 = arith.constant 0 : i32
    return %arg1, %c0_i32, %arg0 : i32, i32, i32
  }
  func.func @transform_8(%arg0: i32, %arg1: i32, %arg2: memref<2x2xi32, #tpu.memory_space<smem>>) -> (i32, i32, i32, i32) {
    %c0_i32 = arith.constant 0 : i32
    %c0_i32_0 = arith.constant 0 : i32
    %c0_i32_1 = arith.constant 0 : i32
    return %arg1, %arg0, %c0_i32, %c0_i32_0 : i32, i32, i32, i32
  }
}

</mosaic_0001>

<bundles_post_ra>
// kernel: tpu_custom_call.1
= control target key start
LH: loop header
LB: loop body
LE: loop exit
PB: predicated region body
PF: predicated region fallthrough
CT: control target
= control target key end

     0   :  { %s2160_s0 = inlined_call_operand.hbm [shape: s32[2,2], index: 0, kind: input, shape index: {}]   ;;  %s2161_s1 = inlined_call_operand.hbm [shape: f32[2,16,256], index: 1, kind: input, shape index: {}]   ;;  %s2162_s2 = inlined_call_operand.hbm [shape: f32[8,16], index: 2, kind: input, shape index: {}]   ;;  %s2163_s3 = inlined_call_operand.vmem [shape: f32[2,1,256], index: 3, kind: input, shape index: {}]   ;;  %s2164_s4 = inlined_call_operand.hbm [shape: f32[2,4,256], index: 4, kind: input, shape index: {}]   ;;  %s2165_s5 = inlined_call_operand.vmem [shape: f32[4,256], index: 5, kind: input, shape index: {}]   ;;  %s2166_s6 = inlined_call_operand.hbm [shape: f32[2,8,256], index: 6, kind: output, shape index: {0}]   ;;  %s2167_s7 = inlined_call_operand.hbm [shape: s32[2,1,256], index: 7, kind: output, shape index: {1}]   ;;  %s2168_s8 = inlined_call_operand.hbm [shape: f32[2,4,256], index: 8, kind: output, shape index: {2}]   ;;  %s2169_s9 = inlined_call_operand.hbm [shape: s32[2,1,8,128], index: 9, kind: output, shape index: {3}]  }
   0x1   :  { %2184 = sst [smem:[#allocation29_spill]] %s2161_s1  ;;  %s1314_s11 = scalar_lea.hbm %s2160_s0, 32 }
   0x2   :  { %p1315_p0 = scmp.ne.s32.totalorder %s2160_s0, %s1314_s11  ;;  %p1318_p1 = scmp.lt.u32.totalorder %s1314_s11, %s2160_s0 }
   0x4   :  { %p1320_p2 = pnand %p1318_p1, %p1315_p0 }
   0x6   :  { %1323 = shalt.err (!%p1320_p2)  }
   0x7   :  { %s1598_s16 = smov [#allocation3]  }
   0x8   :  { %16 = dma.hbm_to_smem %s2160_s0, 32, %s1598_s16, [#allocation2] }
   0x9   :  { %1548 = dma.done.wait [#allocation2], 32 }
   0xa   :  { %1549 = vsyncadd [#allocation2], 4294967264 }
   0xb   :  { %18 = sfence }
   0xc   :  { %19 = vsyncpa [#allocation5], 0 }
   0xd   :  { %21 = vsyncpa [#allocation5 + $0x1], 0 }
   0xe   :  { %22 = vsyncpa [#allocation8], 0 }
   0xf   :  { %23 = vsyncpa [#allocation6], 0 }
  0x10   :  { %25 = vsyncpa [#allocation6 + $0x1], 0 }
  0x11   :  { %26 = vsyncpa [#allocation12], 0 }
  0x12   :  { %28 = vsyncpa [#allocation12 + $0x1], 0 }
  0x13   :  { %29 = vsyncpa [#allocation15], 0 }
  0x14   :  { %31 = vsyncpa [#allocation15 + $0x1], 0  ;;  %s1673_s19 = smov 0   ;;  %s1675_s20 = smov 0  }
  0x15   :  { %s1677_s21 = smov 0   ;;  %s1679_s22 = smov 0  }
  0x16   :  { %s1681_s0 = smov 0   ;;  %s1683_s23 = smov 0  }
  0x17 LB: > { %2185 = sst [smem:[#allocation23_spill]] %s1584_s21  ;;  %s46_s24 = sadd.s32 1, %s1592_s0  ;;  %s1596_s23 = sphi %s1683_s23, %s37_s23   ;;  %s1592_s0 = sphi %s1681_s0, %s2218_s0   ;;  %s1588_s22 = sphi %s1679_s22, %s2217_s22   ;;  %s1584_s21 = sphi %s1677_s21, %s2216_s21   ;;  %s1580_s20 = sphi %s1675_s20, %s2220_s20   ;;  %s1576_s19 = sphi %s1673_s19, %s2219_s19  }
  0x18   : > { %2186 = sst [smem:[#allocation24_spill]] %s1592_s0  ;;  %s58_s25 = sadd.s32 1, %s1584_s21 }
  0x19   : > { %2187 = sst [smem:[#allocation25_spill]] %s1596_s23  ;;  %p47_p3 = scmp.ge.s32.totalorder %s46_s24, 2 }
  0x1a   : > { %p65_p4 = scmp.ne.s32.totalorder %s1584_s21, %s1580_s20  ;;  %p66_p5 = scmp.eq.s32.totalorder %s1596_s23, 0 }
  0x1b   : > { %s2222_s24 = smov (%p47_p3, %s46_s24), 0  ;;  %p1230_p8 = scmp.lt.s32.totalorder %s1596_s23, 2 }
  0x1c   : > { %2188 = sst [smem:[#allocation26_spill]] %s2222_s24  ;;  %p67_p7 = por %p66_p5, %p65_p4 }
  0x1d   : > { %s53_s26 = ssub.s32 %s1592_s0, %s2222_s24  ;;  %s330_s27 = sand.u32 1, %s1596_s23  }
  0x1e   : > { %p56_p9 = scmp.eq.s32.totalorder %s53_s26, 0  ;;  %s332_s28 = sand.u32 1, %s1584_s21  }
  0x1f   : > { %s1178_s29 = sshll.u32 %s1592_s0, 9  ;;  %s1138_s10 = sshll.u32 %s332_s28, 5 }
  0x20   : > { %s1721_s30 = scalar_select %p56_p9, %s1584_s21, %s58_s25  }
  0x21   : > { %s2190_s1 = sld [smem:[#allocation29_spill]]  ;;  %p1730_p10 = pnand %p1230_p8, %p67_p7 }
  0x22   : > { %2189 = sst [smem:[#allocation27_spill]] %s1721_s30  ;;  %s334_s15 = scalar_lea.vmem [#allocation4], %s1138_s10 }
  0x23   : > { %s2191_s14 = scalar_select %p1730_p10, 1, 0 }
  0x24   : > { %s343_s16 = sshll.u32 %s334_s15, 4  ;;  %s1736_s17 = scalar_lea.sflag [#allocation5], %s330_s27  ;;  %s1734_s16 = int_to_ptr.vmem [resolvable:$true] %s343_s16 }
  0x25   : > { %p2178_p12 = pneg %p1730_p10 }
  0x27   : > { %s1728_s13 = scalar_lea.hbm %s2190_s1, %s1178_s29  ;;  %s1329_s29 = scalar_lea.hbm %s2190_s1, 1024 }
  0x28   : > { %s1324_s18 = scalar_lea.hbm %s1728_s13, 512  ;;  %p1330_p1 = scmp.lt.u32.totalorder %s1728_s13, %s2190_s1 }
  0x29   : > { %p1325_p11 = scmp.ne.s32.totalorder %s1728_s13, %s1324_s18  ;;  %p1331_p2 = scmp.lt.u32.totalorder %s1329_s29, %s1324_s18 }
  0x2a   : > { %p1333_p5 = scmp.lt.u32.totalorder %s1324_s18, %s1728_s13 }
  0x2b   : > { %p1327_p13 = pnand %p2178_p12, %p1325_p11  ;;  %p1332_p3 = por %p1331_p2, %p1330_p1 }
  0x2d   : > { %p1328_p0 = pneg %p1327_p13  ;;  %p1334_p7 = por %p1333_p5, %p1332_p3 }
  0x2f   : > { %p1335_p8 = pnand %p1334_p7, %p1328_p0 }
  0x31   : > { %1338 = shalt.err (!%p1335_p8)
}
  0x32   : > { %s1339_s27 = scalar_lea.vmem %s1734_s16, 512  ;;  %s1599_s10 = smov [#allocation4]  }
  0x33   : > { %p1340_p9 = scmp.ne.s32.totalorder %s1734_s16, %s1339_s27  ;;  %s1344_s15 = sshll.u32 %s1599_s10, 4  ;;  %s1345_s15 = int_to_ptr.vmem [resolvable:$false] %s1344_s15 }
  0x34   : > { %s1346_s25 = scalar_lea.vmem %s1345_s15, 1024  ;;  %p1347_p6 = scmp.lt.s32.totalorder %s1734_s16, %s1345_s15 }
  0x35   : > { %p1342_p11 = pnand %p1340_p9, %p2178_p12  ;;  %p1348_p1 = scmp.lt.s32.totalorder %s1346_s25, %s1339_s27 }
  0x37   : > { %p1343_p13 = pneg %p1342_p11  ;;  %p1349_p2 = por %p1348_p1, %p1347_p6 }
  0x39   : > { %p1350_p3 = pnand %p1349_p2, %p1343_p13 }
  0x3b   : > { %1353 = shalt.err (!%p1350_p3)
}
  0x3c   : > { %s1600_s18 = smov 256   ;;  %s1601_s26 = smov 16  }
  0x3d   : > { %1212 = dma.hbm_to_vmem [thread:$0]  (!%p1730_p10), %s1728_s13, 512, %s1734_s16, %s1736_s17, %s1600_s18, %s1600_s18, %s1601_s26  }
  0x3e   : > { %s1765_s29 = sadd.s32 4294967295, %s1596_s23   ;;  %s2170_s11 = sadd.s32 4294967294, %s1596_s23  }
  0x3f   : > { %p71_p6 = scmp.ne.s32.totalorder %s1580_s20, %s1576_s19  ;;  %p2177_p0 = scmp.eq.s32.totalorder %s1765_s29, 0 }
  0x40   : > { %p200_p5 = scmp.eq.s32.totalorder %s1765_s29, 1  ;;  %p206_p7 = scmp.eq.s32.totalorder %s2170_s11, 1 }
  0x41   : > { %p1134_p8 = scmp.ge.s32.totalorder %s1596_s23, 1  ;;  %p1777_p9 = por %p2177_p0, %p71_p6 }
  0x42   : > { %p1784_p11 = por %p200_p5, %p65_p4  ;;  %p1788_p13 = por %p206_p7, %p71_p6 }
  0x43   : > { %s2192_s12 = scalar_select %p1777_p9, 1, 0 }
  0x44   : > { %s2193_s13 = scalar_select %p1784_p11, 1, 0 }
  0x45   : > { %s2194_s16 = scalar_select %p1788_p13, 1, 0 }
  0x46   : > { %p297_p1 = scmp.lt.s32.totalorder %s1596_s23, 3  ;;  %s1602_s10 = smov [#allocation7]  }
  0x47   : > { %2195 = sst [smem:[#allocation28_spill]] %s2194_s16  ;;  %s310_s15 = sshll.u32 %s1602_s10, 4  ;;  %s311_s15 = int_to_ptr.vmem [resolvable:$true] %s310_s15 }
  0x48   : > { %p1793_p2 = pnand %p1134_p8, %p297_p1  ;;  %s1141_s25 = sshll.u32 %s332_s28, 3 }
  0x49   : > { %s1179_s18 = sshll.u32 %s1592_s0, 7  ;;  %s369_s26 = scalar_lea.vmem [#allocation9], %s1141_s25 }
  0x4a   : > { %s2196_s27 = scalar_select %p1793_p2, 1, 0 }
  0x4b   : > { %p1205_p3 = pneg %p1793_p2  ;;  %s379_s11 = sshll.u32 %s369_s26, 4  ;;  %s1813_s11 = int_to_ptr.vmem [resolvable:$true] %s379_s11 }
  0x4c   : > { %s1811_s23 = scalar_lea.hbm %s2164_s4, %s1179_s18  ;;  %s1354_s0 = scalar_lea.hbm %s2162_s2, 128 }
  0x4d   : > { %p1804_p4 = pnand %p1205_p3, %p2177_p0  ;;  %p1355_p6 = scmp.ne.s32.totalorder %s2162_s2, %s1354_s0 }
  0x4e   : > { %p1361_p1 = scmp.lt.u32.totalorder %s1354_s0, %s2162_s2 }
  0x4f   : > { %p1356_p5 = pneg %p1804_p4 }
  0x51   : > { %p1357_p7 = pnand %p1356_p5, %p1355_p6 }
  0x53   : > { %p1358_p8 = pneg %p1357_p7 }
  0x55   : > { %p1363_p3 = pnand %p1361_p1, %p1358_p8 }
  0x57   : > { %1366 = shalt.err (!%p1363_p3)
}
  0x58   : > { %s1367_s24 = scalar_lea.vmem %s311_s15, 128  ;;  %p1375_p11 = scmp.lt.s32.totalorder %s311_s15, %s311_s15 }
  0x59   : > { %p1368_p0 = scmp.ne.s32.totalorder %s311_s15, %s1367_s24  ;;  %p1376_p9 = scmp.lt.s32.totalorder %s1367_s24, %s1367_s24 }
  0x5b   : > { %p1370_p12 = pnand %p1368_p0, %p1356_p5  ;;  %p1377_p2 = por %p1376_p9, %p1375_p11 }
  0x5d   : > { %p1371_p13 = pneg %p1370_p12 }
  0x5f   : > { %p1378_p10 = pnand %p1377_p2, %p1371_p13 }
  0x61   : > { %1381 = shalt.err (!%p1378_p10)
}
  0x62   : > { %1208 = dma.hbm_to_vmem [thread:$0]  (!%p1804_p4), %s2162_s2, 128, %s311_s15, [#allocation8]  }
  0x63   : > { %s1382_s21 = scalar_lea.hbm %s1811_s23, 128  ;;  %p2198_p0 = scmp.ne.s32.totalorder %s2191_s14, 0 }
  0x64   : > { %p1383_p6 = scmp.ne.s32.totalorder %s1811_s23, %s1382_s21  ;;  %s1387_s28 = scalar_lea.hbm %s2164_s4, 256 }
  0x65   : > { %p2199_p12 = pneg %p2198_p0  ;;  %p1388_p10 = scmp.lt.u32.totalorder %s1811_s23, %s2164_s4 }
  0x66   : > { %p1389_p9 = scmp.lt.u32.totalorder %s1387_s28, %s1382_s21  ;;  %p1391_p13 = scmp.lt.u32.totalorder %s1382_s21, %s1811_s23 }
  0x67   : > { %p1385_p5 = pnand %p1383_p6, %p2199_p12 }
  0x68   : > { %p1390_p11 = por %p1389_p9, %p1388_p10 }
  0x69   : > { %p1386_p7 = pneg %p1385_p5 }
  0x6a   : > { %p1392_p2 = por %p1391_p13, %p1390_p11 }
  0x6c   : > { %p1393_p8 = pnand %p1392_p2, %p1386_p7 }
  0x6e   : > { %1396 = shalt.err (!%p1393_p8)
}
  0x6f   : > { %s1397_s15 = scalar_lea.vmem %s1813_s11, 128  ;;  %p2200_p1 = pmov %p2199_p12 }
  0x70   : > { %p1398_p4 = scmp.ne.s32.totalorder %s1813_s11, %s1397_s15  ;;  %s1603_s25 = smov [#allocation9]  }
  0x71   : > { %s1402_s26 = sshll.u32 %s1603_s25, 4  ;;  %s1403_s26 = int_to_ptr.vmem [resolvable:$false] %s1402_s26 }
  0x72   : > { %p1400_p3 = pnand %p1398_p4, %p2200_p1  ;;  %s1404_s24 = scalar_lea.vmem %s1403_s26, 256 }
  0x73   : > { %p1405_p12 = scmp.lt.s32.totalorder %s1813_s11, %s1403_s26  ;;  %p1406_p5 = scmp.lt.s32.totalorder %s1404_s24, %s1397_s15 }
  0x74   : > { %p1401_p6 = pneg %p1400_p3 }
  0x75   : > { %p1407_p10 = por %p1406_p5, %p1405_p12 }
  0x77   : > { %p1408_p9 = pnand %p1407_p10, %p1401_p6 }
  0x79   : > { %1411 = shalt.err (!%p1408_p9)
}
  0x7a   : > { %1215 = dma.hbm_to_vmem [thread:$0]  (!%p2198_p0), %s1811_s23, 128, %s1813_s11, %s1736_s17  }
  0x7b   : > { %p2201_p7 = scmp.ne.s32.totalorder %s2196_s27, 0 }
  0x7c   : > { %s390_s30 = sand.u32 (!%p2201_p7), 1, %s1765_s29   ;;  %s1859_s18 = sand.u32 (!%p2201_p7), 1, %s1580_s20  }
  0x7d   : > { %388 = sbr.rel (%p2201_p7) target bundleno = 626 (0x272), region = 40  ;;  %s1145_s21 = sshll.u32 (!%p2201_p7), %s1859_s18, 5 }
  0x7e   : > { %s391_s0 = scalar_lea.sflag (!%p2201_p7), [#allocation5], %s390_s30  ;;  %s394_s16 = scalar_lea.vmem (!%p2201_p7), [#allocation4], %s1145_s21 }
  0x7f   : > { %p2202_p11 = scmp.ne.s32.totalorder (!%p2201_p7), %s2192_s12, 0 }
  0x84   : > { %1551 = dma.done.wait (%p2202_p11), %s391_s0, 512  }
  0x85   : > { %1553 = vsyncadd (%p2202_p11), %s391_s0, 4294966784  ;;  %p2203_p0 = scmp.eq.s32.totalorder %s1765_s29, 0 }
  0x87   : > { %1555 = dma.done.wait (%p2203_p0), [#allocation8], 128   ;;  %p2204_p13 = pmov %p2203_p0 }
  0x88   : > { %s1873_s23 = sshll.u32 %s1859_s18, 3 }
  0x89   : > { %1557 = vsyncadd (%p2204_p13), [#allocation8], 4294967168  ;;  %s407_s14 = scalar_lea.vmem [#allocation9], %s1873_s23 }
  0x8a   : > { %1559 = dma.done.wait (%p2202_p11), %s391_s0, 128  }
  0x8b   : > { %1561 = vsyncadd (%p2202_p11), %s391_s0, 4294967168  ;;  %v1604_v0 = vmov 0.0   ;;  %v494_v1 = vld [vmem:[%s394_s16 + $0x8] sm:$0xff]  ;;  %v496_v2 = vld [vmem:[%s394_s16 + $0x18] sm:$0xff]  ;;  %vm522_vm0 = vcmask 130048   ;;  %s1886_s12 = sshll.u32 %s1588_s22, 7  ;;  %v607_v45 = vlaneseq }
  0x8c   : > { %590 = vmatprep.mubr.f32.mxu0 %v1604_v0  ;;  %v493_v3 = vld [vmem:[%s394_s16] sm:$0xff]  ;;  %v1154_v4 = vmul.f32 -1.442695, %v494_v1  ;;  %v1156_v5 = vmul.f32 -1.442695, %v496_v2  ;;  %v495_v6 = vld [vmem:[%s394_s16 + $0x10] sm:$0xff] }
  0x8d   : > { %v1153_v7 = vmul.f32 -1.442695, %v493_v3  ;;  %v1155_v8 = vmul.f32 -1.442695, %v495_v6  ;;  %v521_v23 = vld [vmem:[#allocation7] sm:$0xff]  ;;  %v635_v24 = vld [vmem:[%s407_s14] sm:$0xff] }
  0x8e   : > { %1288 = vpow2.f32 %v1154_v4  ;;  %v645_v25 = vmul.f32 0.2, %v635_v24  ;;  %v636_v28 = vld [vmem:[%s2165_s5] sm:$0xff]  ;;  %s671_s27 = sadd.s32 1, %s1886_s12  ;;  %s669_s28 = sld [smem:[#allocation3 + %s1886_s12]]  ;;  %v1891_v48 = vshrl.u32 %v607_v45, 7 }
  0x8f   : > { %1290 = vpow2.f32 %v1156_v5  ;;  %v638_v29 = vrot.slane %v636_v28, 6  ;;  %s672_s1 = sld [smem:[#allocation3 + %s671_s27]]  ;;  %v644_v37 = vmul.f32 0.1, %v635_v24  ;;  %p475_p2 = scmp.lt.s32.totalorder %s1588_s22, 1  ;;  %v1605_v5 = vmov 0  }
  0x90   : > { %1292 = vpow2.f32 %v1153_v7  ;;  %v646_v26 = vmin.f32 %v645_v25, 4.1351666  ;;  %vm676_vm1 = vcmp.eq.s32.totalorder %v1891_v48, 0  ;;  %s1148_s17 = sshll.u32 %s1859_s18, 4  ;;  %s1149_s27 = sshll.u32 %s1859_s18, 1  ;;  %vm782_vm14 = vcmp.lt.s32.totalorder %v607_v45, 256 }
  0x91   : > { %1294 = vpow2.f32 %v1155_v8  ;;  %v640_v30 = vsub.f32 %v636_v28, %v638_v29  ;;  %v642_v34 = vadd.f32 %v638_v29, %v636_v28  ;;  %s476_s24 = scalar_select %p475_p2, %s1588_s22, 1 }
  0x92   : > { %v657_v27 = vmul.f32 1.442695, %v646_v26  ;;  %s2009_s11 = scalar_lea.vmem [#allocation10], %s1148_s17  ;;  %p2209_p4 = scmp.ne.s32.totalorder %s2193_s13, 0 }
  0x93   : > { %v641_v31 = vadd.f32 1.0, %v640_v30  ;;  %v643_v36 = vmul.f32 0.5, %v642_v34  ;;  %s1152_s21 = sshll.u32 %s476_s24, 1  ;;  %v1606_v30 = vmov 1966171168   ;;  %s2028_s24 = scalar_lea.sflag [#allocation12], %s390_s30 }
  0x94   : > { %s670_s15 = scvt.s32.f32 %s669_s28  ;;  %s481_s14 = scalar_lea.vmem %s2163_s3, %s1152_s21 }
  0x95   : > { %v1159_v38 = vrot.slane %v641_v31, 10  ;;  %v1160_v41 = vrot.slane %v643_v36, 10  ;;  %s673_s10 = scvt.s32.f32 %s672_s1  ;;  %v599_v62 = vld [vmem:[%s481_s14] sm:$0x3]  ;;  %s458_s28 = scalar_lea.vmem [#allocation11], %s1149_s27 }
  0x96   : > { %s1164_s26 = sadd.f32 -1.0, %s670_s15  ;;  %v1158_v63 = vmul.f32 -1.442695, %v599_v62  ;;  %s1181_s1 = sshll.u32 %s1588_s22, 5 }
  0x97   : > { %v651_v40 = vmul.f32 %v1159_v38, %v644_v37  ;;  %s1163_s25 = sadd.f32 -1.0, %s673_s10  ;;  %s1607_s0 = smov [#allocation11]  }
  0x98   : > { %v1289_v9 = vpop.eup %1288  ;;  %v680_v52 = vstv %s1164_s26  ;;  %s855_s26 = sshll.u32 %s458_s28, 4  ;;  %s1416_s16 = sshll.u32 %s1607_s0, 4  ;;  %s856_s26 = int_to_ptr.vmem [resolvable:$true] %s855_s26  ;;  %s1417_s16 = int_to_ptr.vmem [resolvable:$false] %s1416_s16 }
  0x99   : > { %v1291_v10 = vpop.eup %1290  ;;  %v510_v11 = vadd.f32 1.0, %v1289_v9  ;;  %v656_v43 = vadd.f32 %v1160_v41, %v651_v40  ;;  %v679_v51 = vstv %s1163_s25  ;;  %v609_v9 = vsub.s32 0, %v1891_v48  ;;  %s2024_s25 = scalar_lea.hbm %s2167_s7, %s1181_s1  ;;  %s1412_s21 = scalar_lea.vmem %s856_s26, 32 }
  0x9a   : > { %v1293_v12 = vpop.eup %1292  ;;  %v512_v13 = vadd.f32 1.0, %v1291_v10  ;;  %v681_v55 = vsel %vm676_vm1, %v679_v51, %v680_v52  ;;  %p1413_p8 = scmp.ne.s32.totalorder %s856_s26, %s1412_s21  ;;  %s1418_s14 = scalar_lea.vmem %s1417_s16, 64 }
  0x9b   : > { %v1295_v14 = vpop.eup %1294  ;;  %1296 = vrcp.f32 %v510_v11  ;;  %v509_v15 = vadd.f32 1.0, %v1293_v12  ;;  %v613_v12 = vsub.s32 1, %v1891_v48  ;;  %p1419_p6 = scmp.lt.s32.totalorder %s856_s26, %s1417_s16  ;;  %p1420_p12 = scmp.lt.s32.totalorder %s1418_s14, %s1412_s21 }
  0x9c   : > { %1298 = vrcp.f32 %v512_v13  ;;  %v511_v16 = vadd.f32 1.0, %v1295_v14  ;;  %p1414_p1 = pnand %p1413_p8, %p2209_p4 }
  0x9d   : > { %1300 = vrcp.f32 %v509_v15  ;;  %p1421_p5 = por %p1420_p12, %p1419_p6 }
  0x9e   : > { %1302 = vrcp.f32 %v511_v16  ;;  %p1415_p3 = pneg %p1414_p1 }
  0x9f   : > { %1304 = vpow2.f32 %v657_v27 }
  0xa0   : > { %1306 = vpow2.f32 %v1158_v63  ;;  %p1422_p10 = pnand %p1421_p5, %p1415_p3 }
  0xa5   : > { %v1297_v17 = vpop.eup %1296 }
  0xa6   : > { %v1299_v18 = vpop.eup %1298 }
  0xa7   : > { %v1301_v19 = vpop.eup %1300  ;;  %v1183_v20 = vpack.c.bf16 %v1299_v18, %v1297_v17 }
  0xa8   : > { %v1303_v21 = vpop.eup %1302 }
  0xa9   : > { %1184 = vmatprep.subr.bf16.mxu0 %v1183_v20  ;;  %v1185_v22 = vpack.c.bf16 %v1303_v21, %v1301_v19  ;;  %v1305_v32 = vpop.eup %1304 }
  0xaa   : > { %v659_v33 = vmul.f32 %v1305_v32, %v641_v31  ;;  %v1307_v0 = vpop.eup %1306  ;;  %v1969_v31 = vunpack.c.l.s4 %v1606_v30 }
  0xab   : > { %1186 = vmatpush1.bf16.msra.mxu0 %v1185_v22  ;;  %v603_v1 = vadd.f32 1.0, %v1307_v0 }
  0xac   : > { %v1161_v35 = vadd.f32 -1.0, %v659_v33 }
  0xad   : > { %1308 = vrcp.f32 %v603_v1 }
  0xae   : > { %1157 = vmatmul.mubr.msk.f32.vlgmr.msra.gmra.mrb[0].mxu0 %vm522_vm0, %v521_v23  ;;  %v661_v39 = vmul.f32 0.5, %v1161_v35 }
  0xb0   : > { %v663_v42 = vrot.slane %v661_v39, 6 }
  0xb2   : > { %v664_v44 = vrot.slane %v663_v42, 4 }
  0xb4   : > { %v666_v46 = vsub.f32 %v656_v43, %v664_v44  ;;  %v667_v47 = vadd.f32 %v664_v44, %v656_v43 }
  0xb6   : > { %v682_v49 = vmax.f32 %v666_v46, 0.0  ;;  %v688_v50 = vmax.f32 %v667_v47, 0.0 }
  0xb7   : > { %v1309_v11 = vpop.eup %1308 }
  0xb8   : > { %v684_v53 = vcombine.high %v682_v49, %v682_v49  ;;  %v690_v54 = vcombine.high %v688_v50, %v688_v50  ;;  %v1894_v56 = vmin.f32 %v681_v55, %v682_v49  ;;  %v1898_v58 = vmin.f32 %v681_v55, %v688_v50 }
  0xb9   : > { %v610_v14 = vrot.slane %v1309_v11, %v609_v9  ;;  %v614_v15 = vrot.slane %v1309_v11, %v613_v12 }
  0xba   : > { %v1896_v57 = vmin.f32 %v681_v55, %v684_v53  ;;  %v1900_v59 = vmin.f32 %v681_v55, %v690_v54  ;;  %v705_v2 = vsub.f32 %v1898_v58, %v1894_v56 }
  0xbc   : > { %v696_v60 = vcombine.low %v1894_v56, %v1896_v57  ;;  %v701_v61 = vcombine.low %v1898_v58, %v1900_v59  ;;  %v706_v3 = vsub.f32 %v1900_v59, %v1896_v57  ;;  %vm1915_vm2 = vcmp.ge.f32.partialorder %v705_v2, 0.0 }
  0xbd   : > { %v709_v6 = vsel %vm1915_vm2, 1, %v1605_v5 }
  0xbe   : > { %vm1922_vm3 = vcmp.ge.f32.partialorder %v706_v3, 0.0  ;;  %v711_v8 = vrot.slane %v709_v6, 1 }
  0xbf   : > { %v710_v10 = vsel %vm1922_vm3, 1, %v1605_v5 }
  0xc0   : > { %v712_v13 = vrot.slane %v710_v10, 1  ;;  %vm713_vm4 = vcmp.ne.s32.totalorder %v711_v8, 0 }
  0xc1   : > { %vm715_vm5 = vmand %vm1915_vm2, %vm713_vm4 }
  0xc2   : > { %vm714_vm6 = vcmp.ne.s32.totalorder %v712_v13, 0  ;;  %v717_v20 = vsel %vm715_vm5, 256, %v1605_v5 }
  0xc3   : > { %vm716_vm9 = vmand %vm1922_vm3, %vm714_vm6 }
  0xc4   : > { %v718_v23 = vsel %vm716_vm9, 256, %v1605_v5 }
 0x181   : > { %v1933_v16 = vpop.f32.mrb[0].mxu0 }
 0x182   : > { %vm597_vm7 = vcmp.gt.f32.partialorder %v1933_v16, 0.05  ;;  %v1937_v17 = vmul.f32 %v610_v14, %v1933_v16  ;;  %v1939_v18 = vpop.f32.mrb[1].mxu0 }
 0x183   : > { %v1942_v19 = vmul.f32 %v614_v15, %v1939_v18  ;;  %vm598_vm8 = vcmp.gt.f32.partialorder %v1939_v18, 0.05  ;;  %v719_v21 = vsel %vm597_vm7, 1, %v1605_v5  ;;  %v723_v24 = vsel %vm597_vm7, 2, %v1605_v5 }
 0x184   : > { %1310 = vrsqrt.f32 %v1937_v17  ;;  %v721_v22 = vadd.s32 %v719_v21, %v717_v20  ;;  %v724_v25 = vsel %vm598_vm8, 2, %v1605_v5  ;;  %v729_v26 = vsel %vm597_vm7, 4, %v1605_v5 }
 0x185   : > { %1312 = vrsqrt.f32 %v1942_v19  ;;  %v753_v27 = vsel %vm597_vm7, 64, %v1605_v5  ;;  %v720_v28 = vsel %vm598_vm8, 1, %v1605_v5  ;;  %v725_v29 = vrot.slane %v723_v24, 1 }
 0x186   : > { %v726_v32 = vrot.slane %v724_v25, 1  ;;  %v730_v33 = vsel %vm598_vm8, 4, %v1605_v5  ;;  %v731_v34 = vrot.slane %v729_v26, 2  ;;  %v735_v35 = vsel %vm597_vm7, 8, %v1605_v5 }
 0x187   : > { %v727_v36 = vadd.s32 %v725_v29, %v721_v22  ;;  %v736_v37 = vsel %vm598_vm8, 8, %v1605_v5  ;;  %v741_v38 = vsel %vm597_vm7, 16, %v1605_v5  ;;  %v742_v39 = vsel %vm598_vm8, 16, %v1605_v5 }
 0x188   : > { %v755_v40 = vrot.slane %v753_v27, 6  ;;  %v748_v41 = vsel %vm598_vm8, 32, %v1605_v5  ;;  %v747_v42 = vsel %vm597_vm7, 32, %v1605_v5  ;;  %v785_v43 = vadd.s32 %v720_v28, %v719_v21 }
 0x189   : > { %v732_v44 = vrot.slane %v730_v33, 2  ;;  %v733_v46 = vadd.s32 %v731_v34, %v727_v36  ;;  %v737_v47 = vrot.slane %v735_v35, 3  ;;  %v722_v49 = vadd.s32 %v720_v28, %v718_v23 }
 0x18a   : > { %v738_v50 = vrot.slane %v736_v37, 3  ;;  %v743_v51 = vrot.slane %v741_v38, 4  ;;  %v744_v52 = vrot.slane %v742_v39, 4  ;;  %v787_v53 = vshrl.u32 %v785_v43, 16 }
 0x18b   : > { %v739_v55 = vadd.s32 %v737_v47, %v733_v46  ;;  %v749_v62 = vrot.slane %v747_v42, 5  ;;  %v728_v63 = vadd.s32 %v726_v32, %v722_v49  ;;  %vm621_vm10 = vcmp.eq.f32.partialorder %v1937_v17, inf }
 0x18c   : > { %v789_v1 = vcvt.s32.f32 %v787_v53  ;;  %v786_v2 = vand.u32 65535, %v785_v43  ;;  %vm623_vm11 = vcmp.eq.f32.partialorder %v1937_v17, 0.0  ;;  %v624_v7 = vand.u32 2147483648, %v1937_v17 }
 0x18d   : > { %v745_v4 = vadd.s32 %v743_v51, %v739_v55  ;;  %v734_v6 = vadd.s32 %v732_v44, %v728_v63  ;;  %vm628_vm12 = vcmp.eq.f32.partialorder %v1942_v19, inf  ;;  %vm630_vm13 = vcmp.eq.f32.partialorder %v1942_v19, 0.0 }
 0x18e   : > { %v1311_v54 = vpop.eup %1310  ;;  %792 = vadd.xlane.f32.xlu0 %v789_v1  ;;  %v631_v10 = vand.u32 2147483648, %v1942_v19  ;;  %v759_v15 = vsel %vm597_vm7, 128, %v1605_v5  ;;  %v754_v20 = vsel %vm598_vm8, 64, %v1605_v5  ;;  %v750_v22 = vrot.slane %v748_v41, 5 }
 0x18f   : > { %v1313_v0 = vpop.eup %1312  ;;  %v620_v3 = vmul.f32 %v1311_v54, %v1937_v17  ;;  %v751_v11 = vadd.s32 %v749_v62, %v745_v4  ;;  %v740_v12 = vadd.s32 %v738_v50, %v734_v6  ;;  %v760_v16 = vsel %vm598_vm8, 128, %v1605_v5 }
 0x190   : > { %v627_v8 = vmul.f32 %v1313_v0, %v1942_v19  ;;  %v756_v25 = vrot.slane %v754_v20, 6  ;;  %v768_v27 = vunpack.c.0.s8 %v1969_v31  ;;  %v762_v28 = vrot.slane %v760_v16, 7 }
 0x191   : > { %v622_v9 = vsel %vm621_vm10, %v1937_v17, %v620_v3  ;;  %v788_v17 = vcvt.s32.f32 %v786_v2  ;;  %v757_v23 = vadd.s32 %v755_v40, %v751_v11  ;;  %v746_v24 = vadd.s32 %v744_v52, %v740_v12 }
 0x192   : > { %v625_v13 = vsel %vm623_vm11, %v624_v7, %v622_v9  ;;  %v629_v14 = vsel %vm628_vm12, %v1942_v19, %v627_v8  ;;  %v761_v19 = vrot.slane %v759_v15, 7  ;;  %v771_v33 = vsub.s32 %v768_v27, %v1891_v48 }
 0x193   : > { %v632_v21 = vsel %vm630_vm13, %v631_v10, %v629_v14  ;;  %633 = vst [vmem:[%s2009_s11] sm:$0xff] %v625_v13  ;;  %790 = vadd.xlane.f32.xlu0 %v788_v17  ;;  %v752_v26 = vadd.s32 %v750_v22, %v746_v24 }
 0x194   : > { %634 = vst [vmem:[%s2009_s11 + $0x8] sm:$0xff] %v632_v21  ;;  %v763_v29 = vadd.s32 %v761_v19, %v757_v23 }
 0x195   : > { %v758_v30 = vadd.s32 %v756_v25, %v752_v26 }
 0x197   : > { %v764_v32 = vadd.s32 %v762_v28, %v758_v30 }
 0x199   : > { %v765_v34 = vcombine.low %v763_v29, %v764_v32 }
 0x19b   : > { %v772_v35 = vrot.slane %v765_v34, %v771_v33 }
 0x19d   : > { %v779_v5 = vrot.slane %v772_v35, %v771_v33 }
 0x19f   : > { %784 = vst.msk [vmem:[%s458_s28] sm:$0x3] %vm782_vm14, %v779_v5 }
 0x1a0   : > { %1425 = shalt.err (!%p1422_p10)
}
 0x1a1   : > { %s1426_s29 = scalar_lea.hbm %s2024_s25, 32  ;;  %s1430_s27 = scalar_lea.hbm %s2167_s7, 64 }
 0x1a2   : > { %p1427_p9 = scmp.ne.s32.totalorder %s2024_s25, %s1426_s29  ;;  %p1431_p0 = scmp.lt.u32.totalorder %s2024_s25, %s2167_s7 }
 0x1a3   : > { %p1432_p13 = scmp.lt.u32.totalorder %s1430_s27, %s1426_s29  ;;  %p1434_p8 = scmp.lt.u32.totalorder %s1426_s29, %s2024_s25 }
 0x1a4   : > { %p1428_p7 = pnand %p1427_p9, %p2209_p4 }
 0x1a5   : > { %p1433_p2 = por %p1432_p13, %p1431_p0 }
 0x1a6   : > { %p1429_p11 = pneg %p1428_p7 }
 0x1a7   : > { %p1435_p1 = por %p1434_p8, %p1433_p2 }
 0x1a9   : > { %p1436_p3 = pnand %p1435_p1, %p1429_p11 }
 0x1ab   : > { %1439 = shalt.err (!%p1436_p3)
}
 0x1ac   : > { %1198 = dma.vmem_to_hbm [thread:$0]  (%p2209_p4), %s856_s26, 32, %s2024_s25, %s2028_s24   ;;  %v702_v45 = vrot.slane %v701_v61, 6 }
 0x1ad   : > { %s1180_s10 = sshll.u32 %s1588_s22, 8  ;;  %s839_s15 = sshll.u32 %s2009_s11, 4  ;;  %s840_s15 = int_to_ptr.vmem [resolvable:$true] %s839_s15 }
 0x1ae   : > { %s2056_s16 = scalar_lea.hbm %s2166_s6, %s1180_s10  ;;  %s808_s14 = scalar_lea.sflag [#allocation6], %s1859_s18 }
 0x1af   : > { %s1440_s29 = scalar_lea.vmem %s840_s15, 256  ;;  %s1608_s30 = smov [#allocation10]  }
 0x1b0   : > { %p1441_p6 = scmp.ne.s32.totalorder %s840_s15, %s1440_s29  ;;  %s1444_s25 = sshll.u32 %s1608_s30, 4  ;;  %s1445_s25 = int_to_ptr.vmem [resolvable:$false] %s1444_s25 }
 0x1b1   : > { %s1446_s26 = scalar_lea.vmem %s1445_s25, 512  ;;  %p1447_p10 = scmp.lt.s32.totalorder %s840_s15, %s1445_s25 }
 0x1b2   : > { %p1442_p12 = pnand %p1441_p6, %p2209_p4  ;;  %p1448_p9 = scmp.lt.s32.totalorder %s1446_s26, %s1440_s29 }
 0x1b4   : > { %p1443_p5 = pneg %p1442_p12  ;;  %p1449_p7 = por %p1448_p9, %p1447_p10 }
 0x1b6   : > { %p1450_p11 = pnand %p1449_p7, %p1443_p5 }
 0x1b8   : > { %1453 = shalt.err (!%p1450_p11)
}
 0x1b9   : > { %s1454_s22 = scalar_lea.hbm %s2056_s16, 256  ;;  %s1458_s27 = scalar_lea.hbm %s2166_s6, 512 }
 0x1ba   : > { %p1455_p0 = scmp.ne.s32.totalorder %s2056_s16, %s1454_s22  ;;  %p1459_p8 = scmp.lt.u32.totalorder %s2056_s16, %s2166_s6 }
 0x1bb   : > { %p1460_p1 = scmp.lt.u32.totalorder %s1458_s27, %s1454_s22  ;;  %p1462_p6 = scmp.lt.u32.totalorder %s1454_s22, %s2056_s16 }
 0x1bc   : > { %p1456_p13 = pnand %p1455_p0, %p2209_p4 }
 0x1bd   : > { %p1461_p3 = por %p1460_p1, %p1459_p8 }
 0x1be   : > { %p1457_p2 = pneg %p1456_p13 }
 0x1bf   : > { %p1463_p12 = por %p1462_p6, %p1461_p3 }
 0x1c1   : > { %p1464_p5 = pnand %p1463_p12, %p1457_p2 }
 0x1c3   : > { %1467 = shalt.err (!%p1464_p5)
}
 0x1c4   : > { %1197 = dma.vmem_to_hbm [thread:$0]  (%p2209_p4), %s840_s15, 256, %s2056_s16, %s808_s14  }
 0x1c5   : > { %s2080_s0 = scalar_lea.hbm %s2168_s8, %s1886_s12  ;;  %s465_s29 = scalar_lea.vmem [#allocation13], %s1873_s23 }
 0x1c6   : > { %698 = vst [vmem:[%s465_s29] sm:$0x33] %v696_v60  ;;  %704 = vst [vmem:[%s465_s29] sm:$0xcc] %v702_v45  ;;  %s871_s30 = sshll.u32 %s465_s29, 4  ;;  %s1609_s26 = smov [#allocation13]   ;;  %s872_s30 = int_to_ptr.vmem [resolvable:$true] %s871_s30 }
 0x1c7   : > { %s1468_s25 = scalar_lea.vmem %s872_s30, 128  ;;  %s1472_s15 = sshll.u32 %s1609_s26, 4  ;;  %s1473_s15 = int_to_ptr.vmem [resolvable:$false] %s1472_s15 }
 0x1c8   : > { %p1469_p10 = scmp.ne.s32.totalorder %s872_s30, %s1468_s25  ;;  %s1474_s16 = scalar_lea.vmem %s1473_s15, 256 }
 0x1c9   : > { %p1475_p11 = scmp.lt.s32.totalorder %s872_s30, %s1473_s15  ;;  %p1476_p0 = scmp.lt.s32.totalorder %s1474_s16, %s1468_s25 }
 0x1ca   : > { %p1470_p9 = pnand %p1469_p10, %p2209_p4 }
 0x1cb   : > { %p1477_p13 = por %p1476_p0, %p1475_p11 }
 0x1cc   : > { %p1471_p7 = pneg %p1470_p9 }
 0x1ce   : > { %p1478_p2 = pnand %p1477_p13, %p1471_p7 }
 0x1d0   : > { %1481 = shalt.err (!%p1478_p2)
}
 0x1d1   : > { %s1482_s14 = scalar_lea.hbm %s2080_s0, 128  ;;  %s1486_s17 = scalar_lea.hbm %s2168_s8, 256 }
 0x1d2   : > { %p1483_p8 = scmp.ne.s32.totalorder %s2080_s0, %s1482_s14  ;;  %p1487_p6 = scmp.lt.u32.totalorder %s2080_s0, %s2168_s8 }
 0x1d3   : > { %p1488_p12 = scmp.lt.u32.totalorder %s1486_s17, %s1482_s14  ;;  %p1490_p10 = scmp.lt.u32.totalorder %s1482_s14, %s2080_s0 }
 0x1d4   : > { %p1484_p1 = pnand %p1483_p8, %p2209_p4 }
 0x1d5   : > { %p1489_p5 = por %p1488_p12, %p1487_p6 }
 0x1d6   : > { %p1485_p3 = pneg %p1484_p1 }
 0x1d7   : > { %p1491_p9 = por %p1490_p10, %p1489_p5 }
 0x1d9   : > { %p1492_p7 = pnand %p1491_p9, %p1485_p3 }
 0x1db   : > { %1495 = shalt.err (!%p1492_p7)
}
 0x1dc   : > { %1199 = dma.vmem_to_hbm [thread:$0]  (%p2209_p4), %s872_s30, 128, %s2080_s0, %s2028_s24  }
 0x1dd   : > { %s472_s1 = scalar_lea.vmem [#allocation14], %s1873_s23  ;;  %s2111_s29 = scalar_lea.hbm %s2169_s9, %s1886_s12 }
 0x1de   : > { %s885_s10 = sshll.u32 %s472_s1, 4  ;;  %s823_s30 = scalar_lea.sflag [#allocation15], %s1859_s18  ;;  %s2105_s10 = int_to_ptr.vmem [resolvable:$true] %s885_s10 }
 0x1df   : > { %s1496_s25 = scalar_lea.vmem %s2105_s10, 128  ;;  %s1610_s23 = smov [#allocation14]  }
 0x1e0   : > { %p1497_p11 = scmp.ne.s32.totalorder %s2105_s10, %s1496_s25  ;;  %s1500_s26 = sshll.u32 %s1610_s23, 4  ;;  %s1501_s26 = int_to_ptr.vmem [resolvable:$false] %s1500_s26 }
 0x1e1   : > { %s1502_s15 = scalar_lea.vmem %s1501_s26, 256  ;;  %p1503_p2 = scmp.lt.s32.totalorder %s2105_s10, %s1501_s26 }
 0x1e2   : > { %p1498_p0 = pnand %p1497_p11, %p2209_p4  ;;  %p1504_p8 = scmp.lt.s32.totalorder %s1502_s15, %s1496_s25 }
 0x1e4   : > { %p1499_p13 = pneg %p1498_p0  ;;  %p1505_p1 = por %p1504_p8, %p1503_p2 }
 0x1e6   : > { %p1506_p3 = pnand %p1505_p1, %p1499_p13 }
 0x21b   : > { %v793_v48 = vpop.xlane.xlu0 %792 }
 0x21c   : > { %v795_v56 = vcvt.f32.s32 %v793_v48 }
 0x21e   : > { %v796_v58 = vshll.u32 %v795_v56, 16 }
 0x220   : > { %v791_v57 = vpop.xlane.xlu0 %790 }
 0x221   : > { %v794_v59 = vcvt.f32.s32 %v791_v57 }
 0x223   : > { %v797_v60 = vadd.s32 %v796_v58, %v794_v59 }
 0x225   : > { %v798_v61 = vrot.slane %v797_v60, 4 }
 0x227   : > { %v799_v18 = vadd.s32 %v798_v61, %v797_v60 }
 0x229   : > { %v800_v31 = vrot.slane %v799_v18, 2 }
 0x22b   : > { %v801_v36 = vadd.s32 %v800_v31, %v799_v18 }
 0x22d   : > { %v802_v37 = vrot.slane %v801_v36, 1 }
 0x22f   : > { %v803_v38 = vadd.s32 %v802_v37, %v801_v36 }
 0x231   : > { %1187 = vpush %v803_v38 }
 0x262   : > { %s1188_s24 = spop %1187 }
 0x263   : > { %v805_v39 = vstv %s1188_s24 }
 0x264   : > { %806 = vst [vmem:[%s472_s1] sm:$0xff] %v805_v39 }
 0x265   : > { %1509 = shalt.err (!%p1506_p3)
}
 0x266   : > { %s1510_s18 = scalar_lea.hbm %s2111_s29, 128  ;;  %s1514_s14 = scalar_lea.hbm %s2169_s9, 256 }
 0x267   : > { %p1511_p6 = scmp.ne.s32.totalorder %s2111_s29, %s1510_s18  ;;  %p1515_p10 = scmp.lt.u32.totalorder %s2111_s29, %s2169_s9 }
 0x268   : > { %p1516_p9 = scmp.lt.u32.totalorder %s1514_s14, %s1510_s18  ;;  %p1518_p11 = scmp.lt.u32.totalorder %s1510_s18, %s2111_s29 }
 0x269   : > { %p1512_p12 = pnand %p1511_p6, %p2209_p4 }
 0x26a   : > { %p1517_p7 = por %p1516_p9, %p1515_p10 }
 0x26b   : > { %p1513_p5 = pneg %p1512_p12 }
 0x26c   : > { %p1519_p0 = por %p1518_p11, %p1517_p7 }
 0x26e   : > { %p1520_p13 = pnand %p1519_p0, %p1513_p5 }
 0x270   : > { %1523 = shalt.err (!%p1520_p13)
}
 0x271   : > { %1200 = dma.vmem_to_hbm [thread:$0]  (%p2209_p4), %s2105_s10, 128, %s2111_s29, %s823_s30  }
 0x272 PF: > { %s2210_s17 = sld [smem:[#allocation28_spill]]  ;;  %s2211_s27 = sld [smem:[#allocation25_spill]] }
 0x273   : > { %s897_s28 = sand.u32 1, %s1576_s19  }
 0x274   : > { %s898_s1 = scalar_lea.sflag [#allocation6], %s897_s28 }
 0x278   : > { %p2212_p2 = scmp.ne.s32.totalorder %s2210_s17, 0  ;;  %p2213_p8 = scmp.ge.s32.totalorder %s2211_s27, 2 }
 0x27a   : > { %p1217_p1 = pnand %p2213_p8, %p2212_p2 }
 0x27c   : > { %1563 = dma.done.wait (!%p1217_p1), %s898_s1, 256  }
 0x27d   : > { %1565 = vsyncadd (!%p1217_p1), %s898_s1, 4294967040  ;;  %s2214_s24 = sadd.s32 4294967294, %s2211_s27  }
 0x27e   : > { %s906_s21 = sand.u32 1, %s2214_s24  }
 0x27f   : > { %s907_s0 = scalar_lea.sflag [#allocation12], %s906_s21 }
 0x280   : > { %1567 = dma.done.wait (!%p1217_p1), %s907_s0, 160  }
 0x281   : > { %1569 = vsyncadd (!%p1217_p1), %s907_s0, 4294967136  ;;  %s925_s13 = scalar_lea.sflag [#allocation15], %s897_s28 }
 0x282   : > { %1571 = dma.done.wait (!%p1217_p1), %s925_s13, 128  }
 0x283   : > { %1573 = vsyncadd (!%p1217_p1), %s925_s13, 4294967168  ;;  %s37_s23 = sadd.s32 1, %s2211_s27   ;;  %s2215_s10 = sld [smem:[#allocation23_spill]] }
 0x284   : > { %p34_p4 = scmp.ge.s32.totalorder %s37_s23, 4   ;;  %s2216_s21 = sld [smem:[#allocation27_spill]] }
 0x285   : > { %s2217_s22 = sld [smem:[#allocation24_spill]]  ;;  %s2218_s0 = sld [smem:[#allocation26_spill]] }
 0x286   : > { %s2219_s19 = smov %s1580_s20  ;;  %36 = sbr.rel (!%p34_p4) target bundleno = 23 (0x17), region = 155 }
 0x289   : > { %s2220_s20 = smov %s2215_s10 }
 0x28d   :  { %930 = vsyncpa [#allocation5], 1 }
 0x28e   :  { %932 = vsyncpa [#allocation5 + $0x1], 1 }
 0x28f   :  { %933 = vsyncpa [#allocation8], 1 }
 0x290   :  { %934 = vsyncpa [#allocation6], 1 }
 0x291   :  { %936 = vsyncpa [#allocation6 + $0x1], 1 }
 0x292   :  { %937 = vsyncpa [#allocation12], 1 }
 0x293   :  { %939 = vsyncpa [#allocation12 + $0x1], 1 }
 0x294   :  { %940 = vsyncpa [#allocation15], 1 }
 0x295   :  { %942 = vsyncpa [#allocation15 + $0x1], 1 }

</bundles_post_ra>
